<compile_context>
chip_gen: v5e
topology: v5e:2x2
jax: 0.10.0
libtpu: 0.0.40
codegen_flags: <defaults>
</compile_context>

<pallas_src>
import functools

import jax
import jax.numpy as jnp
from jax.experimental import pallas as pl
from jax.experimental.pallas import tpu as pltpu


def _prompt_assemble_kernel(prefix_ref, ctx_ref, suffix_ref, out_ref):
    # prefix_ref: (C_BLK, 1, D)
    # ctx_ref:    (n_ctx, D)  shared  OR  (C_BLK, n_ctx, D)  class-specific
    # suffix_ref: (C_BLK, suf_len, D)
    # out_ref:    (C_BLK, 1 + n_ctx + suf_len, D)
    c_blk, _, d = out_ref.shape
    n_ctx = ctx_ref.shape[-2]
    suf_len = suffix_ref.shape[1]

    # SOS token per class.
    out_ref[:, 0:1, :] = prefix_ref[...]

    # Learnable context tokens.
    if ctx_ref.ndim == 2:
        # Generic context: single broadcast store for all C_BLK classes.
        out_ref[:, 1:1 + n_ctx, :] = jnp.broadcast_to(
            ctx_ref[...], (c_blk, n_ctx, d))
    else:
        # Class-specific context (CSC=True): straight copy.
        out_ref[:, 1:1 + n_ctx, :] = ctx_ref[...]

    # Class name + EOS tokens per class.
    out_ref[:, 1 + n_ctx:1 + n_ctx + suf_len, :] = suffix_ref[...]


def _per_class_block_bytes(n_ctx, suf_len, seq_len, ctx_dim, itemsize, csc):
    """HBM<->VMEM bytes moved per class per step (inputs + output), x2 buffers."""
    per_class = (1 + suf_len + seq_len) * ctx_dim * itemsize
    if csc:
        per_class += n_ctx * ctx_dim * itemsize
    return 2 * per_class  # double-buffered pipeline


def _choose_class_block(n_cls, n_ctx, suf_len, seq_len, ctx_dim, itemsize, csc):
    """Pick how many classes to process per grid step.

    Returns (c_blk, needs_pad).  Prefers a divisor of n_cls (no padding) when
    one exists near the VMEM-budget cap.
    """
    budget = 28 * 1024 * 1024  # fits v7x 64 MiB VMEM with headroom
    per_class = _per_class_block_bytes(n_ctx, suf_len, seq_len, ctx_dim,
                                       itemsize, csc)
    cap = max(1, budget // per_class)
    cap = min(cap, 512)
    # Keep >= 2 grid steps when possible so both v7x TensorCores get work
    # (no-op on single-TC v5e/v6e).
    cap = min(cap, max(1, -(-n_cls // 2)))
    cap = int(min(cap, n_cls))

    # Largest divisor of n_cls not exceeding cap -> full blocks, no pad copies.
    best_div = 1
    d = 1
    while d * d <= n_cls:
        if n_cls % d == 0:
            for cand in (d, n_cls // d):
                if cand <= cap and cand > best_div:
                    best_div = cand
        d += 1
    if 2 * best_div >= cap:
        return best_div, False
    return cap, True


@functools.partial(jax.jit, static_argnames=("class_token_position",))
def prompt_learner_forward(ctx, token_prefix, token_suffix,
                           class_token_position="end"):
    """Pallas implementation of PromptLearner.forward().

    ctx:          (n_ctx, D) generic context, or (n_cls, n_ctx, D) CSC context
    token_prefix: (n_cls, 1, D)
    token_suffix: (n_cls, suf_len, D)
    returns:      (n_cls, 1 + n_ctx + suf_len, D)
    """
    if class_token_position != "end":
        # TODO(synk): 'middle'/'front' require per-class name_lens-driven ragged
        # splits of the suffix (data-dependent concat); not implemented here.
        raise NotImplementedError("only class_token_position='end' is implemented")

    n_cls = token_prefix.shape[0]
    csc = ctx.ndim == 3
    n_ctx, ctx_dim = ctx.shape[-2], ctx.shape[-1]
    suf_len = token_suffix.shape[1]
    seq_len = 1 + n_ctx + suf_len
    dtype = token_prefix.dtype
    itemsize = jnp.dtype(dtype).itemsize

    # Cast the learnable context to the frozen-embedding dtype once (tiny
    # tensor), so the kernel is a pure copy with no per-step casts.
    ctx = ctx.astype(dtype)
    token_suffix = token_suffix.astype(dtype)

    c_blk, needs_pad = _choose_class_block(n_cls, n_ctx, suf_len, seq_len,
                                           ctx_dim, itemsize, csc)

    n_steps = -(-n_cls // c_blk)
    n_cls_pad = n_steps * c_blk
    if needs_pad and n_cls_pad != n_cls:
        pad = n_cls_pad - n_cls
        token_prefix = jnp.pad(token_prefix, ((0, pad), (0, 0), (0, 0)))
        token_suffix = jnp.pad(token_suffix, ((0, pad), (0, 0), (0, 0)))
        if csc:
            ctx = jnp.pad(ctx, ((0, pad), (0, 0), (0, 0)))

    if csc:
        ctx_spec = pl.BlockSpec((c_blk, n_ctx, ctx_dim), lambda i: (i, 0, 0))
    else:
        # Constant block index -> ctx stays resident in VMEM across all steps.
        ctx_spec = pl.BlockSpec((n_ctx, ctx_dim), lambda i: (0, 0))

    grid_spec = pltpu.PrefetchScalarGridSpec(
        num_scalar_prefetch=0,
        grid=(n_steps,),
        in_specs=[
            pl.BlockSpec((c_blk, 1, ctx_dim), lambda i: (i, 0, 0)),
            ctx_spec,
            pl.BlockSpec((c_blk, suf_len, ctx_dim), lambda i: (i, 0, 0)),
        ],
        out_specs=pl.BlockSpec((c_blk, seq_len, ctx_dim), lambda i: (i, 0, 0)),
    )

    # Derive the VMEM request from the actual per-step footprint (plus the
    # resident shared ctx and a little headroom) instead of over-requesting.
    vmem_usage = c_blk * _per_class_block_bytes(n_ctx, suf_len, seq_len,
                                                ctx_dim, itemsize, csc)
    if not csc:
        vmem_usage += n_ctx * ctx_dim * itemsize
    vmem_limit = int(min(vmem_usage + (8 << 20), 48 << 20))

    prompts = pl.pallas_call(
        _prompt_assemble_kernel,
        out_shape=jax.ShapeDtypeStruct((n_cls_pad, seq_len, ctx_dim), dtype),
        grid_spec=grid_spec,
        compiler_params=pltpu.CompilerParams(
            dimension_semantics=("parallel",),
            vmem_limit_bytes=vmem_limit,
        ),
    )(token_prefix, ctx, token_suffix)

    if n_cls_pad != n_cls:
        prompts = prompts[:n_cls]
    return prompts


if __name__ == "__main__":
    # Small synthetic shapes consistent with the module:
    #   n_cls classes, n_ctx context tokens, ctx_dim embedding dim,
    #   total tokenized sequence length seq_len.
    n_cls, n_ctx, ctx_dim, seq_len = 4, 4, 128, 16
    suf_len = seq_len - 1 - n_ctx
    dtype = jnp.float32

    key = jax.random.PRNGKey(0)
    k_ctx, k_pre, k_suf, k_csc = jax.random.split(key, 4)

    # nn.init.normal_(ctx_vectors, std=0.02)
    ctx = (0.02 * jax.random.normal(k_ctx, (n_ctx, ctx_dim))).astype(dtype)
    # frozen CLIP token embeddings (synthetic, deterministic)
    token_prefix = jax.random.normal(k_pre, (n_cls, 1, ctx_dim)).astype(dtype)
    token_suffix = jax.random.normal(k_suf, (n_cls, suf_len, ctx_dim)).astype(dtype)

    # --- generic-context path (CSC=False, default CoOp) ---
    prompts = prompt_learner_forward(ctx, token_prefix, token_suffix,
                                     class_token_position="end")
    prompts = jax.block_until_ready(prompts)

    ctx_exp = jnp.broadcast_to(ctx[None, :, :], (n_cls, n_ctx, ctx_dim))
    ref = jnp.concatenate([token_prefix, ctx_exp, token_suffix], axis=1)
    assert prompts.shape == (n_cls, seq_len, ctx_dim)
    assert jnp.allclose(prompts, ref), "mismatch vs reference (generic ctx)"

    # --- class-specific-context path (CSC=True) ---
    ctx_csc = (0.02 * jax.random.normal(k_csc, (n_cls, n_ctx, ctx_dim))).astype(dtype)
    prompts_csc = prompt_learner_forward(ctx_csc, token_prefix, token_suffix,
                                         class_token_position="end")
    prompts_csc = jax.block_until_ready(prompts_csc)
    ref_csc = jnp.concatenate([token_prefix, ctx_csc, token_suffix], axis=1)
    assert jnp.allclose(prompts_csc, ref_csc), "mismatch vs reference (CSC ctx)"

    # --- non-divisible class count (exercises divisor/pad path) ---
    n_cls2 = 5
    tp2 = jax.random.normal(k_pre, (n_cls2, 1, ctx_dim)).astype(dtype)
    ts2 = jax.random.normal(k_suf, (n_cls2, suf_len, ctx_dim)).astype(dtype)
    prompts2 = jax.block_until_ready(
        prompt_learner_forward(ctx, tp2, ts2, class_token_position="end"))
    ref2 = jnp.concatenate(
        [tp2, jnp.broadcast_to(ctx[None], (n_cls2, n_ctx, ctx_dim)), ts2], axis=1)
    assert jnp.allclose(prompts2, ref2), "mismatch vs reference (n_cls=5)"

    print("KERNEL_OK")
</pallas_src>

<mosaic_0001>
module attributes {stable_mosaic.version = 11 : i64} {
  func.func @_prompt_assemble_kernel(%arg0: i32, %arg1: memref<2x1x128xf32, #tpu.memory_space<vmem>>, %arg2: memref<4x128xf32, #tpu.memory_space<vmem>>, %arg3: memref<2x11x128xf32, #tpu.memory_space<vmem>>, %arg4: memref<2x16x128xf32, #tpu.memory_space<vmem>>) attributes {dimension_semantics = [#tpu.dimension_semantics<parallel>], iteration_bounds = array<i64: 2>, scalar_prefetch = 0 : i64, scratch_operands = 0 : i64, tpu.core_type = #tpu.core_type<tc>, window_params = [{transform_indices = @transform_0, window_bounds = array<i64: 2, 1, 128>}, {pipeline_mode = #tpu.pipeline_mode<synchronous>, transform_indices = @transform_1, window_bounds = array<i64: 4, 128>}, {transform_indices = @transform_2, window_bounds = array<i64: 2, 11, 128>}, {transform_indices = @transform_3, window_bounds = array<i64: 2, 16, 128>}]} {
    %c0 = arith.constant 0 : index
    %c0_0 = arith.constant 0 : index
    %c0_1 = arith.constant 0 : index
    %0 = vector.load %arg1[%c0, %c0_0, %c0_1] : memref<2x1x128xf32, #tpu.memory_space<vmem>>, vector<2x1x128xf32>
    %c0_2 = arith.constant 0 : index
    %c0_3 = arith.constant 0 : index
    %c0_4 = arith.constant 0 : index
    %1 = vector.load %arg4[%c0_2, %c0_3, %c0_4] : memref<2x16x128xf32, #tpu.memory_space<vmem>>, vector<2x1x128xf32>
    tpu.vector_store %arg4[%c0_2, %c0_3, %c0_4], %0 {strides = array<i32>} : memref<2x16x128xf32, #tpu.memory_space<vmem>>, vector<2x1x128xf32>,
    %c0_5 = arith.constant 0 : index
    %c0_6 = arith.constant 0 : index
    %2 = vector.load %arg2[%c0_5, %c0_6] : memref<4x128xf32, #tpu.memory_space<vmem>>, vector<4x128xf32>
    %3 = vector.shape_cast %2 : vector<4x128xf32> to vector<1x4x128xf32>
    %4 = vector.broadcast %3 : vector<1x4x128xf32> to vector<2x4x128xf32>
    %c0_7 = arith.constant 0 : index
    %c1 = arith.constant 1 : index
    %c0_8 = arith.constant 0 : index
    %5 = vector.load %arg4[%c0_7, %c1, %c0_8] : memref<2x16x128xf32, #tpu.memory_space<vmem>>, vector<2x4x128xf32>
    tpu.vector_store %arg4[%c0_7, %c1, %c0_8], %4 {strides = array<i32>} : memref<2x16x128xf32, #tpu.memory_space<vmem>>, vector<2x4x128xf32>,
    %c0_9 = arith.constant 0 : index
    %c0_10 = arith.constant 0 : index
    %c0_11 = arith.constant 0 : index
    %6 = vector.load %arg3[%c0_9, %c0_10, %c0_11] : memref<2x11x128xf32, #tpu.memory_space<vmem>>, vector<2x11x128xf32>
    %c0_12 = arith.constant 0 : index
    %c5 = arith.constant 5 : index
    %c0_13 = arith.constant 0 : index
    %7 = vector.load %arg4[%c0_12, %c5, %c0_13] : memref<2x16x128xf32, #tpu.memory_space<vmem>>, vector<2x11x128xf32>
    tpu.vector_store %arg4[%c0_12, %c5, %c0_13], %6 {strides = array<i32>} : memref<2x16x128xf32, #tpu.memory_space<vmem>>, vector<2x11x128xf32>,
    return
  }
  func.func @transform_0(%arg0: i32) -> (i32, i32, i32) {
    %c0_i32 = arith.constant 0 : i32
    %c0_i32_0 = arith.constant 0 : i32
    %c0_i32_1 = arith.constant 0 : i32
    return %arg0, %c0_i32, %c0_i32_0 : i32, i32, i32
  }
  func.func @transform_1(%arg0: i32) -> (i32, i32) {
    %c0_i32 = arith.constant 0 : i32
    %c0_i32_0 = arith.constant 0 : i32
    %c0_i32_1 = arith.constant 0 : i32
    return %c0_i32, %c0_i32_0 : i32, i32
  }
  func.func @transform_2(%arg0: i32) -> (i32, i32, i32) {
    %c0_i32 = arith.constant 0 : i32
    %c0_i32_0 = arith.constant 0 : i32
    %c0_i32_1 = arith.constant 0 : i32
    return %arg0, %c0_i32, %c0_i32_0 : i32, i32, i32
  }
  func.func @transform_3(%arg0: i32) -> (i32, i32, i32) {
    %c0_i32 = arith.constant 0 : i32
    %c0_i32_0 = arith.constant 0 : i32
    %c0_i32_1 = arith.constant 0 : i32
    return %arg0, %c0_i32, %c0_i32_0 : i32, i32, i32
  }
}

</mosaic_0001>

<bundles_post_ra>
// kernel: prompt_learner_forward.1
= control target key start
LH: loop header
LB: loop body
LE: loop exit
PB: predicated region body
PF: predicated region fallthrough
CT: control target
= control target key end

     0   :  { %8 = vsyncpa [#allocation3], 0  ;;  %s536_s0 = inlined_call_operand.vmem [shape: f32[4,1,128], index: 0, kind: input, shape index: {}]   ;;  %s537_s1 = inlined_call_operand.vmem [shape: f32[4,128], index: 1, kind: input, shape index: {}]   ;;  %s538_s2 = inlined_call_operand.vmem [shape: f32[4,11,128], index: 2, kind: input, shape index: {}]   ;;  %s539_s3 = inlined_call_operand.hbm [shape: f32[4,16,128], index: 3, kind: output, shape index: {}]  }
   0x1   :  { %10 = vsyncpa [#allocation3 + $0x1], 0  ;;  %s442_s12 = smov 0   ;;  %s444_s13 = smov 0  }
   0x2   :  { %s446_s14 = smov 0   ;;  %s448_s15 = smov 0  }
   0x3 LB: > { %s463_s16 = sadd.s32 4294967295, %s418_s15   ;;  %s297_s17 = sadd.s32 4294967294, %s418_s15   ;;  %s418_s15 = sphi %s448_s15, %s545_s15   ;;  %s414_s14 = sphi %s446_s14, %s544_s14   ;;  %s410_s13 = sphi %s444_s13, %s543_s13   ;;  %s406_s12 = sphi %s442_s12, %s542_s12  }
   0x4   : > { %s467_s18 = sadd.s32 1, %s418_s15   ;;  %s96_s19 = sadd.s32 1, %s414_s14 }
   0x5   : > { %s93_s20 = ssub.s32 %s418_s15, %s467_s18  ;;  %p106_p0 = scmp.ne.s32.totalorder %s414_s14, %s410_s13 }
   0x6   : > { %p94_p1 = scmp.eq.s32.totalorder %s93_s20, 0  ;;  %p107_p2 = scmp.eq.s32.totalorder %s463_s16, 1 }
   0x7   : > { %p112_p3 = scmp.ne.s32.totalorder %s410_s13, %s406_s12  ;;  %p113_p4 = scmp.eq.s32.totalorder %s297_s17, 1 }
   0x8   : > { %s478_s21 = scalar_select %p94_p1, %s414_s14, %s96_s19  }
   0x9   : > { %p480_p5 = por %p107_p2, %p106_p0  ;;  %p484_p6 = por %p113_p4, %p112_p3 }
   0xa   : > { %p300_p7 = scmp.ge.s32.totalorder %s418_s15, 1  ;;  %p152_p8 = scmp.lt.s32.totalorder %s418_s15, 3 }
   0xc   : > { %p153_p9 = pnand %p300_p7, %p152_p8 }
   0xd   : > { %s178_s24 = sand.u32 (!%p153_p9), 1, %s410_s13   ;;  %s302_s25 = sshll.u32 (!%p153_p9), %s463_s16, 1 }
   0xe   : > { %156 = sbr.rel (%p153_p9) target bundleno = 35 (0x23), region = 32  ;;  %s301_s28 = sshll.u32 (!%p153_p9), %s178_s24, 5 }
   0xf   : > { %p182_p10 = scmp.lt.s32.totalorder (!%p153_p9), %s302_s25, 3  ;;  %s180_s29 = scalar_lea.vmem (!%p153_p9), [#allocation2], %s301_s28 }
  0x10   : > { %s314_s30 = sshll.u32 (!%p153_p9), %s463_s16, 5  ;;  %s223_s7 = sshll.u32 (!%p153_p9), %s180_s29, 4  ;;  %s224_s7 = int_to_ptr.vmem [resolvable:$true] %s223_s7 }
  0x11   : > { %s222_s11 = scalar_lea.hbm (!%p153_p9), %s539_s3, %s314_s30  ;;  %s210_s16 = scalar_lea.sflag (!%p153_p9), [#allocation3], %s178_s24 }
  0x12   : > { %s225_s26 = sshll.u32 (!%p153_p9), %s222_s11, 4  ;;  %s376_s4 = scalar_lea.hbm (!%p153_p9), %s539_s3, 64  ;;  %s226_s26 = int_to_ptr.hbm [resolvable:$true] %s225_s26 }
  0x13   : > { %v198_v0 = vld [vmem:[%s537_s1] sm:$0xf]  ;;  %s547_s25 = smov (!%p182_p10, %s302_s25), 3 }
  0x14   : > { %199 = vst [vmem:[%s180_s29 + $0x1] sm:$0xf] %v198_v0  ;;  %s184_s6 = scalar_lea.vmem %s536_s0, %s547_s25  ;;  %s312_s8 = sshll.u32 %s547_s25, 4 }
  0x15   : > { %200 = vst [vmem:[%s180_s29 + $0x11] sm:$0xf] %v198_v0  ;;  %v194_v1 = vld [vmem:[%s184_s6] sm:$0x1]  ;;  %v195_v2 = vld [vmem:[%s184_s6 + $0x1] sm:$0x1]  ;;  %s191_s20 = scalar_lea.vmem %s538_s2, %s312_s8 }
  0x16   : > { %196 = vst [vmem:[%s180_s29] sm:$0x1] %v194_v1  ;;  %v201_v3 = vld [vmem:[%s191_s20] sm:$0xff]  ;;  %v202_v4 = vld [vmem:[%s191_s20 + $0x8] sm:$0x7]  ;;  %v203_v5 = vld [vmem:[%s191_s20 + $0x10] sm:$0xff]  ;;  %s370_s25 = sshra.s32 %s226_s26, 4  ;;  %s371_s25 = int_to_ptr.hbm [resolvable:$true] %s370_s25 }
  0x17   : > { %197 = vst [vmem:[%s180_s29 + $0x10] sm:$0x1] %v195_v2  ;;  %v204_v6 = vld [vmem:[%s191_s20 + $0x18] sm:$0x7]  ;;  %s372_s27 = scalar_lea.hbm %s371_s25, 32  ;;  %p377_p0 = scmp.lt.s32.totalorder %s371_s25, %s539_s3 }
  0x18   : > { %205 = vst [vmem:[%s180_s29 + $0x5] sm:$0xff] %v201_v3  ;;  %p373_p11 = scmp.ne.s32.totalorder %s371_s25, %s372_s27  ;;  %p378_p1 = scmp.lt.s32.totalorder %s376_s4, %s372_s27 }
  0x19   : > { %206 = vst [vmem:[%s180_s29 + $0xd] sm:$0x7] %v202_v4 }
  0x1a   : > { %207 = vst [vmem:[%s180_s29 + $0x15] sm:$0xff] %v203_v5  ;;  %p374_p12 = pnand %p373_p11, %p480_p5  ;;  %p379_p2 = por %p378_p1, %p377_p0 }
  0x1b   : > { %208 = vst [vmem:[%s180_s29 + $0x1d] sm:$0x7] %v204_v6 }
  0x1c   : > { %p375_p13 = pneg %p374_p12 }
  0x1e   : > { %p380_p3 = pnand %p379_p2, %p375_p13 }
  0x20   : > { %383 = shalt.err (!%p380_p3)
}
  0x21   : > { %s420_s24 = smov 128   ;;  %s421_s29 = smov 8  }
  0x22   : > { %315 = dma.vmem_to_hbm [thread:$0]  (%p480_p5), %s224_s7, 512, %s226_s26, %s210_s16, %s420_s24, %s420_s24, %s421_s29  }
  0x23 PF: > { %p321_p4 = scmp.ge.s32.totalorder %s418_s15, 2  ;;  %s240_s8 = sand.u32 1, %s406_s12  }
  0x24   : > { %s241_s9 = scalar_lea.sflag [#allocation3], %s240_s8 }
  0x25   : > { %p318_p7 = pnand %p321_p4, %p484_p6 }
  0x27   : > { %p319_p8 = pneg %p318_p7 }
  0x29   : > { %401 = dma.done.wait (%p319_p8), %s241_s9, 512  }
  0x2a   : > { %403 = vsyncadd (%p319_p8), %s241_s9, 4294966784  ;;  %p13_p9 = scmp.ge.s32.totalorder %s467_s18, 4   ;;  %s542_s12 = smov %s410_s13 }
  0x2b   : > { %s543_s13 = smov %s414_s14  ;;  %s544_s14 = smov %s478_s21 }
  0x2c   : > { %s545_s15 = smov %s467_s18  ;;  %15 = sbr.rel (!%p13_p9) target bundleno = 3 (0x3), region = 70 }
  0x31   :  { %247 = vsyncpa [#allocation3], 1 }
  0x32   :  { %249 = vsyncpa [#allocation3 + $0x1], 1 }

</bundles_post_ra>
